<compile_context>
chip_gen: v7x
topology: tpu7x:2x2x1
jax: 0.10.0
libtpu: 0.0.40
codegen_flags: <defaults>
</compile_context>

<pallas_src>
import functools
from typing import NamedTuple

import jax
import jax.numpy as jnp
from jax.experimental import pallas as pl
from jax.experimental.pallas import tpu as pltpu

HIDDEN_SIZE = 128      # from the PyTorch module
INPUT_SIZE = 512       # stand-in for len(vectorizer.get_feature_names_out())
NUM_CLASSES = 32       # stand-in for len(label_encoder.classes_)
BATCH = 12             # deliberately not a multiple of the tile to test padding


def _round_up(n, m):
    return ((n + m - 1) // m) * m


def _cdiv(a, b):
    return (a + b - 1) // b


class ParamMeta(NamedTuple):
    F: int       # original vocab size
    H: int       # original hidden size
    C: int       # original number of classes
    tk_eff: int  # K tile baked into the padded weight layout


# ---------------------------------------------------------------------------
# Kernels
# ---------------------------------------------------------------------------
def _mlp_resident_kernel(x_ref, w1_ref, b1_ref, w2_ref, b2_ref, o_ref):
    """Whole W1 resident in VMEM; grid = (batch tiles,)."""
    h = jnp.dot(x_ref[...], w1_ref[...], preferred_element_type=jnp.float32)
    h = jnp.maximum(h + b1_ref[...], 0.0)
    out = jnp.dot(h.astype(w2_ref.dtype), w2_ref[...],
                  preferred_element_type=jnp.float32)
    o_ref[...] = (out + b2_ref[...]).astype(o_ref.dtype)


def _mlp_streamk_kernel(x_ref, w1_ref, b1_ref, w2_ref, b2_ref, o_ref, acc_ref):
    """W1 streamed over the K (vocab) axis; grid = (batch tiles, K tiles)."""
    k = pl.program_id(1)

    @pl.when(k == 0)
    def _():
        acc_ref[...] = jnp.zeros_like(acc_ref)

    # fc1 partial sum for this K tile: (tb, tk)bf16 @ (tk, H)bf16 -> f32 acc.
    acc_ref[...] += jnp.dot(x_ref[...], w1_ref[...],
                            preferred_element_type=jnp.float32)

    @pl.when(k == pl.num_programs(1) - 1)
    def _():
        h = jnp.maximum(acc_ref[...] + b1_ref[...], 0.0)
        out = jnp.dot(h.astype(w2_ref.dtype), w2_ref[...],
                      preferred_element_type=jnp.float32)
        o_ref[...] = (out + b2_ref[...]).astype(o_ref.dtype)


# ---------------------------------------------------------------------------
# One-time weight preparation (hoisted out of the forward path)
# ---------------------------------------------------------------------------
def prepare_params(w1, b1, w2, b2, *, tk=8192):
    """Pad + cast the weights once.

    w1: (F, H), b1: (H,), w2: (H, C), b2: (C,) — weights stored [in, out]
    (transposed vs. PyTorch's [out, in]) so the kernel computes x @ W + b.
    """
    F, H = w1.shape
    H2, C = w2.shape
    assert H2 == H and b1.shape == (H,) and b2.shape == (C,)

    F_128 = _round_up(F, 128)
    num_k = _cdiv(F_128, max(tk, 128))
    tk_eff = _round_up(_cdiv(F_128, num_k), 128)   # minimise K padding
    F_pad = num_k * tk_eff
    H_pad = _round_up(H, 128)
    C_pad = max(_round_up(C, 128), 128)            # lane-dense output stores

    w1p = jnp.zeros((F_pad, H_pad), jnp.bfloat16).at[:F, :H].set(
        w1.astype(jnp.bfloat16))
    b1p = jnp.zeros((1, H_pad), jnp.float32).at[:, :H].set(
        b1.reshape(1, H).astype(jnp.float32))
    w2p = jnp.zeros((H_pad, C_pad), jnp.bfloat16).at[:H, :C].set(
        w2.astype(jnp.bfloat16))
    b2p = jnp.zeros((1, C_pad), jnp.float32).at[:, :C].set(
        b2.reshape(1, C).astype(jnp.float32))

    return (w1p, b1p, w2p, b2p), ParamMeta(F, H, C, tk_eff)


def _w1_stream_spec(tk_eff, H_pad):
    # Triple-buffer the single streamed operand to hide residual DMA latency;
    # fall back to default double buffering if pipeline_mode is unavailable.
    try:
        return pl.BlockSpec((tk_eff, H_pad), lambda i, k: (k, 0),
                            pipeline_mode=pl.Buffered(3))
    except TypeError:
        return pl.BlockSpec((tk_eff, H_pad), lambda i, k: (k, 0))


# ---------------------------------------------------------------------------
# Forward pass
# ---------------------------------------------------------------------------
@functools.partial(jax.jit, static_argnames=("meta", "tb"))
def recipe_model_forward(x, params, meta, *, tb=128):
    """x: (B, F) f32 count matrix; (params, meta) from prepare_params()."""
    w1p, b1p, w2p, b2p = params
    B, F = x.shape
    assert F == meta.F
    F_pad, H_pad = w1p.shape
    C_pad = w2p.shape[1]
    tk_eff = meta.tk_eff
    num_k = F_pad // tk_eff

    # Batch tile: multiple of 16 (bf16 packs 16 rows per sublane group).
    tb_eff = min(tb, _round_up(B, 16))
    B_pad = _round_up(B, tb_eff)
    nb = B_pad // tb_eff

    # Only x is padded/cast per call; weights were prepared once.
    xb = jnp.zeros((B_pad, F_pad), jnp.bfloat16).at[:B, :F].set(
        x.astype(jnp.bfloat16))

    flops = 2 * B_pad * F_pad * H_pad + 2 * B_pad * H_pad * C_pad
    bytes_accessed = (xb.size * 2 + w1p.size * 2 + w2p.size * 2
                      + b1p.size * 4 + b2p.size * 4 + B_pad * C_pad * 4)
    cost = pl.CostEstimate(flops=flops, transcendentals=0,
                           bytes_accessed=bytes_accessed)

    # VMEM footprint estimate (buffered tiles + accumulator), with headroom;
    # stays well inside v7x's 64 MiB physical VMEM at the default tk=8192.
    footprint = (2 * tb_eff * tk_eff * 2          # x tiles (bf16, 2 bufs)
                 + 3 * tk_eff * H_pad * 2         # W1 tiles (bf16, <=3 bufs)
                 + tb_eff * H_pad * 4             # f32 accumulator
                 + 2 * H_pad * C_pad * 2          # W2
                 + 2 * tb_eff * C_pad * 4         # output tiles
                 + 2 * (H_pad + C_pad) * 4)       # biases
    vmem_limit = int(min(max(2 * footprint, 16 * 2**20), 64 * 2**20))

    if num_k == 1:
        # Small-vocab path: W1 resident, single-step grid, no scratch.
        out_padded = pl.pallas_call(
            _mlp_resident_kernel,
            out_shape=jax.ShapeDtypeStruct((B_pad, C_pad), jnp.float32),
            grid_spec=pltpu.PrefetchScalarGridSpec(
                num_scalar_prefetch=0,
                grid=(nb,),
                in_specs=[
                    pl.BlockSpec((tb_eff, F_pad), lambda i: (i, 0)),   # x
                    pl.BlockSpec((F_pad, H_pad), lambda i: (0, 0)),    # W1
                    pl.BlockSpec((1, H_pad), lambda i: (0, 0)),        # b1
                    pl.BlockSpec((H_pad, C_pad), lambda i: (0, 0)),    # W2
                    pl.BlockSpec((1, C_pad), lambda i: (0, 0)),        # b2
                ],
                out_specs=pl.BlockSpec((tb_eff, C_pad), lambda i: (i, 0)),
            ),
            compiler_params=pltpu.CompilerParams(
                dimension_semantics=("parallel",),
                vmem_limit_bytes=vmem_limit),
            cost_estimate=cost,
        )(xb, w1p, b1p, w2p, b2p)
    else:
        # Large-vocab path: stream W1 over K with an f32 accumulator.
        out_padded = pl.pallas_call(
            _mlp_streamk_kernel,
            out_shape=jax.ShapeDtypeStruct((B_pad, C_pad), jnp.float32),
            grid_spec=pltpu.PrefetchScalarGridSpec(
                num_scalar_prefetch=0,
                grid=(nb, num_k),
                in_specs=[
                    pl.BlockSpec((tb_eff, tk_eff), lambda i, k: (i, k)),  # x
                    _w1_stream_spec(tk_eff, H_pad),                       # W1
                    pl.BlockSpec((1, H_pad), lambda i, k: (0, 0)),        # b1
                    pl.BlockSpec((H_pad, C_pad), lambda i, k: (0, 0)),    # W2
                    pl.BlockSpec((1, C_pad), lambda i, k: (0, 0)),        # b2
                ],
                out_specs=pl.BlockSpec((tb_eff, C_pad), lambda i, k: (i, 0)),
                scratch_shapes=[pltpu.VMEM((tb_eff, H_pad), jnp.float32)],
            ),
            compiler_params=pltpu.CompilerParams(
                dimension_semantics=("parallel", "arbitrary"),
                vmem_limit_bytes=vmem_limit),
            cost_estimate=cost,
        )(xb, w1p, b1p, w2p, b2p)

    # Padded rows B..B_pad-1 hold relu(b1)@W2+b2 garbage; sliced off here.
    return out_padded[:B, :meta.C]


def init_params(key, input_size, hidden_size, num_classes):
    # Deterministic init mimicking nn.Linear default (uniform +/- 1/sqrt(fan_in)).
    k1, k2, k3, k4 = jax.random.split(key, 4)
    lim1 = 1.0 / jnp.sqrt(input_size)
    lim2 = 1.0 / jnp.sqrt(hidden_size)
    w1 = jax.random.uniform(k1, (input_size, hidden_size), jnp.float32, -lim1, lim1)
    b1 = jax.random.uniform(k2, (hidden_size,), jnp.float32, -lim1, lim1)
    w2 = jax.random.uniform(k3, (hidden_size, num_classes), jnp.float32, -lim2, lim2)
    b2 = jax.random.uniform(k4, (num_classes,), jnp.float32, -lim2, lim2)
    return w1, b1, w2, b2


if __name__ == "__main__":
    key = jax.random.PRNGKey(0)
    kx, kp = jax.random.split(key)
    # CountVectorizer output is a nonnegative count matrix [batch, vocab].
    x = jax.random.randint(kx, (BATCH, INPUT_SIZE), 0, 3).astype(jnp.float32)
    w1, b1, w2, b2 = init_params(kp, INPUT_SIZE, HIDDEN_SIZE, NUM_CLASSES)

    # Path 1: default tk -> single K tile -> resident-weights kernel.
    params, meta = prepare_params(w1, b1, w2, b2)
    out = recipe_model_forward(x, params, meta)
    jax.block_until_ready(out)
    assert out.shape == (BATCH, NUM_CLASSES)

    # Path 2: force K streaming (tk=256 -> two K tiles) so the accumulator
    # kernel used at realistic vocab sizes is also exercised.
    params_s, meta_s = prepare_params(w1, b1, w2, b2, tk=256)
    out_s = recipe_model_forward(x, params_s, meta_s)
    jax.block_until_ready(out_s)
    assert out_s.shape == (BATCH, NUM_CLASSES)

    # Reference with matching numerics (bf16 MXU operands, f32 accumulation).
    xb = x.astype(jnp.bfloat16)
    h_ref = jnp.maximum(
        jnp.dot(xb, w1.astype(jnp.bfloat16),
                preferred_element_type=jnp.float32) + b1[None, :], 0.0)
    ref = jnp.dot(h_ref.astype(jnp.bfloat16), w2.astype(jnp.bfloat16),
                  preferred_element_type=jnp.float32) + b2[None, :]

    assert jnp.allclose(out, ref, atol=1e-2, rtol=1e-2)
    assert jnp.allclose(out_s, ref, atol=1e-2, rtol=1e-2)

    print("KERNEL_OK")
</pallas_src>

<mosaic_0001>
module attributes {stable_mosaic.version = 11 : i64} {
  func.func @_mlp_resident_kernel(%arg0: i32, %arg1: memref<16x512xbf16, #tpu.memory_space<vmem>>, %arg2: memref<512x128xbf16, #tpu.memory_space<vmem>>, %arg3: memref<1x128xf32, #tpu.memory_space<vmem>>, %arg4: memref<128x128xbf16, #tpu.memory_space<vmem>>, %arg5: memref<1x128xf32, #tpu.memory_space<vmem>>, %arg6: memref<16x128xf32, #tpu.memory_space<vmem>>) attributes {dimension_semantics = [#tpu.dimension_semantics<parallel>], iteration_bounds = array<i64: 1>, scalar_prefetch = 0 : i64, scratch_operands = 0 : i64, tpu.core_type = #tpu.core_type<tc>, window_params = [{transform_indices = @transform_0, window_bounds = array<i64: 16, 512>}, {pipeline_mode = #tpu.pipeline_mode<synchronous>, transform_indices = @transform_1, window_bounds = array<i64: 512, 128>}, {pipeline_mode = #tpu.pipeline_mode<synchronous>, transform_indices = @transform_2, window_bounds = array<i64: 1, 128>}, {pipeline_mode = #tpu.pipeline_mode<synchronous>, transform_indices = @transform_3, window_bounds = array<i64: 128, 128>}, {pipeline_mode = #tpu.pipeline_mode<synchronous>, transform_indices = @transform_4, window_bounds = array<i64: 1, 128>}, {transform_indices = @transform_5, window_bounds = array<i64: 16, 128>}]} {
    %c0 = arith.constant 0 : index
    %c0_0 = arith.constant 0 : index
    %0 = vector.load %arg1[%c0, %c0_0] : memref<16x512xbf16, #tpu.memory_space<vmem>>, vector<16x512xbf16>
    %c0_1 = arith.constant 0 : index
    %c0_2 = arith.constant 0 : index
    %1 = vector.load %arg2[%c0_1, %c0_2] : memref<512x128xbf16, #tpu.memory_space<vmem>>, vector<512x128xbf16>
    %cst = arith.constant dense<0.000000e+00> : vector<16x128xf32>
    %2 = tpu.matmul %0, %1, %cst {dimension_numbers = #tpu.dot_dimension_numbers<[1], [0], [0], [1], [0, 0, 1, 1], [], []>} : vector<16x512xbf16>, vector<512x128xbf16>, vector<16x128xf32> -> vector<16x128xf32>
    %c0_3 = arith.constant 0 : index
    %c0_4 = arith.constant 0 : index
    %3 = vector.load %arg3[%c0_3, %c0_4] : memref<1x128xf32, #tpu.memory_space<vmem>>, vector<1x128xf32>
    %4 = vector.broadcast %3 : vector<1x128xf32> to vector<16x128xf32>
    %5 = arith.addf %2, %4 : vector<16x128xf32>
    %cst_5 = arith.constant 0.000000e+00 : f32
    %6 = vector.broadcast %cst_5 : f32 to vector<16x128xf32>
    %7 = arith.maximumf %5, %6 : vector<16x128xf32>
    %8 = arith.truncf %7 : vector<16x128xf32> to vector<16x128xbf16>
    %c0_6 = arith.constant 0 : index
    %c0_7 = arith.constant 0 : index
    %9 = vector.load %arg4[%c0_6, %c0_7] : memref<128x128xbf16, #tpu.memory_space<vmem>>, vector<128x128xbf16>
    %cst_8 = arith.constant dense<0.000000e+00> : vector<16x128xf32>
    %10 = tpu.matmul %8, %9, %cst_8 {dimension_numbers = #tpu.dot_dimension_numbers<[1], [0], [0], [1], [0, 0, 1, 1], [], []>} : vector<16x128xbf16>, vector<128x128xbf16>, vector<16x128xf32> -> vector<16x128xf32>
    %c0_9 = arith.constant 0 : index
    %c0_10 = arith.constant 0 : index
    %11 = vector.load %arg5[%c0_9, %c0_10] : memref<1x128xf32, #tpu.memory_space<vmem>>, vector<1x128xf32>
    %12 = vector.broadcast %11 : vector<1x128xf32> to vector<16x128xf32>
    %13 = arith.addf %10, %12 : vector<16x128xf32>
    %c0_11 = arith.constant 0 : index
    %c0_12 = arith.constant 0 : index
    %14 = vector.load %arg6[%c0_11, %c0_12] : memref<16x128xf32, #tpu.memory_space<vmem>>, vector<16x128xf32>
    tpu.vector_store %arg6[%c0_11, %c0_12], %13 {strides = array<i32>} : memref<16x128xf32, #tpu.memory_space<vmem>>, vector<16x128xf32>,
    return
  }
  func.func @transform_0(%arg0: i32) -> (i32, i32) {
    %c0_i32 = arith.constant 0 : i32
    %c0_i32_0 = arith.constant 0 : i32
    return %arg0, %c0_i32 : i32, i32
  }
  func.func @transform_1(%arg0: i32) -> (i32, i32) {
    %c0_i32 = arith.constant 0 : i32
    %c0_i32_0 = arith.constant 0 : i32
    %c0_i32_1 = arith.constant 0 : i32
    return %c0_i32, %c0_i32_0 : i32, i32
  }
  func.func @transform_2(%arg0: i32) -> (i32, i32) {
    %c0_i32 = arith.constant 0 : i32
    %c0_i32_0 = arith.constant 0 : i32
    %c0_i32_1 = arith.constant 0 : i32
    return %c0_i32, %c0_i32_0 : i32, i32
  }
  func.func @transform_3(%arg0: i32) -> (i32, i32) {
    %c0_i32 = arith.constant 0 : i32
    %c0_i32_0 = arith.constant 0 : i32
    %c0_i32_1 = arith.constant 0 : i32
    return %c0_i32, %c0_i32_0 : i32, i32
  }
  func.func @transform_4(%arg0: i32) -> (i32, i32) {
    %c0_i32 = arith.constant 0 : i32
    %c0_i32_0 = arith.constant 0 : i32
    %c0_i32_1 = arith.constant 0 : i32
    return %c0_i32, %c0_i32_0 : i32, i32
  }
  func.func @transform_5(%arg0: i32) -> (i32, i32) {
    %c0_i32 = arith.constant 0 : i32
    %c0_i32_0 = arith.constant 0 : i32
    return %arg0, %c0_i32 : i32, i32
  }
}

</mosaic_0001>

<bundles_post_ra>
// kernel: recipe_model_forward.1
= control target key start
LH: loop header
LB: loop body
LE: loop exit
PB: predicated region body
PF: predicated region fallthrough
CT: control target
= control target key end

     0   :  { %10 = vsyncpa [#allocation3], 0  ;;  %s864_s0 = inlined_call_operand.vmem [shape: bf16[16,512], index: 0, kind: input, shape index: {}]   ;;  %s865_s1 = inlined_call_operand.hbm [shape: bf16[512,128], index: 1, kind: input, shape index: {}]   ;;  %s866_s2 = inlined_call_operand.vmem [shape: f32[1,128], index: 2, kind: input, shape index: {}]   ;;  %s867_s3 = inlined_call_operand.vmem [shape: bf16[128,128], index: 3, kind: input, shape index: {}]   ;;  %s868_s4 = inlined_call_operand.vmem [shape: f32[1,128], index: 4, kind: input, shape index: {}]   ;;  %s869_s5 = inlined_call_operand.hbm [shape: f32[16,128], index: 5, kind: output, shape index: {}]  }
   0x1   :  { %11 = vsyncpa [#allocation4], 0  ;;  %s760_s18 = smov [#allocation2]   ;;  %s712_s22 = scalar_lea.hbm %s865_s1, 4096 }
   0x2   :  { %s19_s19 = sshll.u32 %s760_s18, 4  ;;  %p713_p0 = scmp.ne.s32.totalorder %s865_s1, %s712_s22  ;;  %s20_s19 = int_to_ptr.vmem [resolvable:$true] %s19_s19 }
   0x3   :  { %p716_p1 = scmp.lt.u32.totalorder %s712_s22, %s865_s1 }
   0x5   :  { %p718_p2 = pnand %p716_p1, %p713_p0 }
   0x7   :  { %721 = shalt.err (!%p718_p2)
}
   0x8   :  { %s722_s27 = scalar_lea.vmem %s20_s19, 4096  ;;  %p727_p4 = scmp.lt.s32.totalorder %s20_s19, %s20_s19 }
   0x9   :  { %p723_p3 = scmp.ne.s32.totalorder %s20_s19, %s722_s27  ;;  %p728_p5 = scmp.lt.s32.totalorder %s722_s27, %s722_s27 }
   0xb   :  { %p729_p6 = por %p728_p5, %p727_p4 }
   0xd   :  { %p730_p7 = pnand %p729_p6, %p723_p3 }
   0xf   :  { %733 = shalt.err (!%p730_p7)
}
  0x10   :  { %s761_s28 = smov 64   ;;  %s762_s29 = smov 4  }
  0x11   :  { %25 = dma.hbm_to_vmem [thread:$0]  %s865_s1, 4096, %s20_s19, [#allocation3], %s761_s28, %s761_s28, %s762_s29  }
  0x12   :  { %756 = dma.done.wait [#allocation3], 4096  }
  0x13   :  { %757 = vsyncadd [#allocation3], 4294963200  ;;  %v666_v0 = vld [vmem:[#allocation2 + $0x40] sm:$0xff]   ;;  %v670_v4 = vld [vmem:[#allocation2 + $0x48] sm:$0xff]   ;;  %v763_v34 = vmov 0.0   ;;  %vm764_vm0 = vmmov 0  }
  0x14   :  { %v667_v1 = vld [vmem:[#allocation2 + $0xc0] sm:$0xff]   ;;  %585 = vmatprep.subr.bf16.mxu0 %v666_v0  ;;  %v671_v5 = vld [vmem:[#allocation2 + $0xc8] sm:$0xff]   ;;  %v674_v8 = vld [vmem:[#allocation2 + $0x50] sm:$0xff]   ;;  %s765_s6 = smov [#allocation5]  }
  0x15   :  { %v668_v2 = vld [vmem:[#allocation2] sm:$0xff]   ;;  %607 = vmatprep.subr.bf16.mxu1 %v667_v1  ;;  %v672_v6 = vld [vmem:[#allocation2 + $0x8] sm:$0xff]   ;;  %v675_v9 = vld [vmem:[#allocation2 + $0xd0] sm:$0xff]   ;;  %s527_s1 = sshll.u32 %s765_s6, 4  ;;  %s528_s1 = int_to_ptr.vmem [resolvable:$true] %s527_s1 }
  0x16   :  { %v669_v3 = vld [vmem:[#allocation2 + $0x80] sm:$0xff]   ;;  %586 = vmatpush3.bf16.msra.mxu0 %v668_v2  ;;  %v673_v7 = vld [vmem:[#allocation2 + $0x88] sm:$0xff]   ;;  %v676_v10 = vld [vmem:[#allocation2 + $0x10] sm:$0xff]   ;;  %s734_s7 = scalar_lea.vmem %s528_s1, 256  ;;  %p739_p9 = scmp.lt.s32.totalorder %s528_s1, %s528_s1 }
  0x17   :  { %608 = vmatpush3.bf16.msra.mxu1 %v669_v3  ;;  %587 = vmatprep.subr.bf16.mxu0 %v670_v4  ;;  %v677_v11 = vld [vmem:[#allocation2 + $0x90] sm:$0xff]   ;;  %v678_v12 = vld [vmem:[#allocation2 + $0x58] sm:$0xff]   ;;  %v682_v16 = vld [vmem:[#allocation2 + $0x60] sm:$0xff]   ;;  %p735_p8 = scmp.ne.s32.totalorder %s528_s1, %s734_s7  ;;  %p740_p10 = scmp.lt.s32.totalorder %s734_s7, %s734_s7 }
  0x18   :  { %609 = vmatprep.subr.bf16.mxu1 %v671_v5  ;;  %v679_v13 = vld [vmem:[#allocation2 + $0xd8] sm:$0xff]   ;;  %v683_v17 = vld [vmem:[#allocation2 + $0xe0] sm:$0xff]   ;;  %v686_v20 = vld [vmem:[#allocation2 + $0x68] sm:$0xff]  }
  0x19   :  { %v680_v14 = vld [vmem:[#allocation2 + $0x18] sm:$0xff]   ;;  %v684_v18 = vld [vmem:[#allocation2 + $0x20] sm:$0xff]   ;;  %v687_v21 = vld [vmem:[#allocation2 + $0xe8] sm:$0xff]   ;;  %p741_p11 = por %p740_p10, %p739_p9 }
  0x1a   :  { %588 = vmatpush3.bf16.msra.mxu0 %v672_v6  ;;  %v681_v15 = vld [vmem:[#allocation2 + $0x98] sm:$0xff]   ;;  %v685_v19 = vld [vmem:[#allocation2 + $0xa0] sm:$0xff]   ;;  %v688_v22 = vld [vmem:[#allocation2 + $0x28] sm:$0xff]  }
  0x1b   :  { %610 = vmatpush3.bf16.msra.mxu1 %v673_v7  ;;  %589 = vmatprep.subr.bf16.mxu0 %v674_v8  ;;  %v689_v23 = vld [vmem:[#allocation2 + $0xa8] sm:$0xff]   ;;  %v690_v24 = vld [vmem:[#allocation2 + $0x70] sm:$0xff]   ;;  %v694_v28 = vld [vmem:[#allocation2 + $0x78] sm:$0xff]   ;;  %p742_p12 = pnand %p741_p11, %p735_p8 }
  0x1c   :  { %611 = vmatprep.subr.bf16.mxu1 %v675_v9  ;;  %v691_v25 = vld [vmem:[#allocation2 + $0xf0] sm:$0xff]   ;;  %v695_v29 = vld [vmem:[#allocation2 + $0xf8] sm:$0xff]   ;;  %v704_v37 = vld [vmem:[%s867_s3] sm:$0xff]  }
  0x1d   :  { %v692_v26 = vld [vmem:[#allocation2 + $0x30] sm:$0xff]   ;;  %v696_v30 = vld [vmem:[#allocation2 + $0x38] sm:$0xff]   ;;  %v705_v38 = vld [vmem:[%s867_s3 + $0x8] sm:$0xff]  }
  0x1e   :  { %590 = vmatpush3.bf16.msra.mxu0 %v676_v10  ;;  %v693_v27 = vld [vmem:[#allocation2 + $0xb0] sm:$0xff]   ;;  %v697_v31 = vld [vmem:[#allocation2 + $0xb8] sm:$0xff]   ;;  %v708_v41 = vld [vmem:[%s867_s3 + $0x20] sm:$0xff]  }
  0x1f   :  { %612 = vmatpush3.bf16.msra.mxu1 %v677_v11  ;;  %591 = vmatprep.subr.bf16.mxu0 %v678_v12  ;;  %v698_v32 = vld [vmem:[%s864_s0] ss:$16 sps:$4 sm:$0xff]   ;;  %v700_v33 = vld [vmem:[%s864_s0 + $0x4] ss:$16 sps:$4 sm:$0xff]   ;;  %v701_v35 = vld [vmem:[%s864_s0 + $0x8] ss:$16 sps:$4 sm:$0xff]  }
  0x20   :  { %613 = vmatprep.subr.bf16.mxu1 %v679_v13  ;;  %v703_v36 = vld [vmem:[%s864_s0 + $0xc] ss:$16 sps:$4 sm:$0xff]   ;;  %355 = vmatprep.mubr.bf16.mxu0 %v700_v33  ;;  %v706_v39 = vld [vmem:[%s867_s3 + $0x10] sm:$0xff]   ;;  %v539_v47 = vld [vmem:[%s866_s2] ss:$0 sm:$0xff] }
  0x21   :  { %396 = vmatprep.mubr.bf16.mxu1 %v703_v36  ;;  %v707_v40 = vld [vmem:[%s867_s3 + $0x18] sm:$0xff]   ;;  %v709_v42 = vld [vmem:[%s867_s3 + $0x28] sm:$0xff]   ;;  %v710_v43 = vld [vmem:[%s867_s3 + $0x30] sm:$0xff]  }
  0x22   :  { %592 = vmatpush3.bf16.msra.mxu0 %v680_v14  ;;  %v711_v44 = vld [vmem:[%s867_s3 + $0x38] sm:$0xff]   ;;  %v576_v1 = vld [vmem:[%s868_s4] ss:$0 sm:$0xff] }
  0x23   :  { %614 = vmatpush3.bf16.msra.mxu1 %v681_v15  ;;  %593 = vmatprep.subr.bf16.mxu0 %v682_v16 }
  0x24   :  { %615 = vmatprep.subr.bf16.mxu1 %v683_v17 }
  0x26   :  { %594 = vmatpush3.bf16.msra.mxu0 %v684_v18 }
  0x27   :  { %616 = vmatpush3.bf16.msra.mxu1 %v685_v19  ;;  %595 = vmatprep.subr.bf16.mxu0 %v686_v20 }
  0x28   :  { %617 = vmatprep.subr.bf16.mxu1 %v687_v21 }
  0x2a   :  { %596 = vmatpush3.bf16.msra.mxu0 %v688_v22 }
  0x2b   :  { %618 = vmatpush3.bf16.msra.mxu1 %v689_v23  ;;  %597 = vmatprep.subr.bf16.mxu0 %v690_v24 }
  0x2c   :  { %619 = vmatprep.subr.bf16.mxu1 %v691_v25 }
  0x2e   :  { %598 = vmatpush3.bf16.msra.mxu0 %v692_v26 }
  0x2f   :  { %620 = vmatpush3.bf16.msra.mxu1 %v693_v27  ;;  %599 = vmatprep.subr.bf16.mxu0 %v694_v28 }
  0x30   :  { %621 = vmatprep.subr.bf16.mxu1 %v695_v29 }
  0x32   :  { %600 = vmatpush3.bf16.msra.mxu0 %v696_v30 }
  0x33   :  { %622 = vmatpush3.bf16.msra.mxu1 %v697_v31  ;;  %638 = vmatprep.subr.bf16.mxu0 %v763_v34 }
  0x35   :  { %356 = vmatmul.mubr.bf16.vlgmr.msra.gmra.mrb[0].mxu0 %v698_v32 }
  0x36   :  { %397 = vmatmul.mubr.bf16.vlgmr.msra.gmra.mrb[0].mxu1 %v701_v35  ;;  %639 = vmatpush3.bf16.msra.mxu0 %v704_v37 }
  0x37   :  { %640 = vmatprep.subr.bf16.mxu0 %v763_v34  ;;  %654 = vmatprep.mubr.msk.bf16.mxu0 %vm764_vm0, %v763_v34 }
  0x3a   :  { %641 = vmatpush3.bf16.msra.mxu0 %v705_v38 }
  0x3b   :  { %642 = vmatprep.subr.bf16.mxu0 %v763_v34 }
  0x3e   :  { %643 = vmatpush3.bf16.msra.mxu0 %v706_v39 }
  0x3f   :  { %644 = vmatprep.subr.bf16.mxu0 %v763_v34 }
  0x42   :  { %645 = vmatpush3.bf16.msra.mxu0 %v707_v40 }
  0x43   :  { %646 = vmatprep.subr.bf16.mxu0 %v763_v34 }
  0x46   :  { %647 = vmatpush3.bf16.msra.mxu0 %v708_v41 }
  0x47   :  { %648 = vmatprep.subr.bf16.mxu0 %v763_v34 }
  0x4a   :  { %649 = vmatpush3.bf16.msra.mxu0 %v709_v42 }
  0x4b   :  { %650 = vmatprep.subr.bf16.mxu0 %v763_v34 }
  0x4e   :  { %651 = vmatpush3.bf16.msra.mxu0 %v710_v43 }
  0x4f   :  { %652 = vmatprep.subr.bf16.mxu0 %v763_v34 }
  0x52   :  { %653 = vmatpush3.bf16.msra.mxu0 %v711_v44 }
 0x108   :  { %v601_v45 = vpop.f32.mrb[0].mxu0 }
 0x109   :  { %v623_v46 = vpop.f32.mrb[0].mxu1  ;;  %v602_v48 = vpop.f32.mrb[1].mxu0 }
 0x10a   :  { %v603_v49 = vadd.f32 %v602_v48, %v601_v45  ;;  %v624_v50 = vpop.f32.mrb[1].mxu1  ;;  %v604_v51 = vpop.f32.mrb[2].mxu0 }
 0x10b   :  { %v625_v52 = vadd.f32 %v624_v50, %v623_v46  ;;  %v626_v53 = vpop.f32.mrb[2].mxu1  ;;  %v605_v54 = vpop.f32.mrb[3].mxu0 }
 0x10c   :  { %v358_v55 = vadd.f32 %v603_v49, %v539_v47  ;;  %v606_v56 = vadd.f32 %v605_v54, %v604_v51  ;;  %v627_v57 = vpop.f32.mrb[3].mxu1 }
 0x10d   :  { %v628_v58 = vadd.f32 %v627_v57, %v626_v53 }
 0x10e   :  { %v399_v59 = vadd.f32 %v625_v52, %v358_v55  ;;  %v361_v60 = vadd.f32 %v606_v56, %v539_v47 }
 0x110   :  { %v402_v61 = vadd.f32 %v628_v58, %v361_v60  ;;  %v405_v62 = vmax.f32 %v399_v59, 0.0 }
 0x112   :  { %v406_v63 = vmax.f32 %v402_v61, 0.0 }
 0x114   :  { %v407_v0 = vpack.c.bf16 %v406_v63, %v405_v62 }
 0x116   :  { %655 = vmatmul.mubr.bf16.vlgmr.msra.gmra.mrb[4].mxu0 %v407_v0 }
 0x1e9   :  { %v513_v2 = vpop.f32.mrb[4].mxu0 }
 0x1ea   :  { %v514_v3 = vadd.f32 %v576_v1, %v513_v2  ;;  %v656_v4 = vpop.f32.mrb[5].mxu0 }
 0x1eb   :  { %v516_v5 = vpop.f32.mrb[6].mxu0 }
 0x1ec   :  { %520 = vst [vmem:[#allocation5] sm:$0xff] %v514_v3  ;;  %v517_v6 = vadd.f32 %v576_v1, %v516_v5  ;;  %v657_v7 = vpop.f32.mrb[7].mxu0 }
 0x1ee   :  { %521 = vst [vmem:[#allocation5 + $0x8] sm:$0xff] %v517_v6 }
 0x1ef   :  { %745 = shalt.err (!%p742_p12)
}
 0x1f0   :  { %s746_s9 = scalar_lea.hbm %s869_s5, 256 }
 0x1f1   :  { %p747_p13 = scmp.ne.s32.totalorder %s869_s5, %s746_s9  ;;  %p750_p0 = scmp.lt.u32.totalorder %s746_s9, %s869_s5 }
 0x1f3   :  { %p752_p1 = pnand %p750_p0, %p747_p13 }
 0x1f5   :  { %755 = shalt.err (!%p752_p1)
}
 0x1f6   :  { %s766_s14 = smov 128   ;;  %s767_s15 = smov 8  }
 0x1f7   :  { %533 = dma.vmem_to_hbm [thread:$0]  %s528_s1, 256, %s869_s5, [#allocation4], %s766_s14, %s766_s14, %s767_s15  }
 0x1f8   :  { %758 = dma.done.wait [#allocation4], 256  }
 0x1f9   :  { %759 = vsyncadd [#allocation4], 4294967040 }
 0x1fa   :  { %537 = vsyncpa [#allocation3], 1 }
 0x1fb   :  { %538 = vsyncpa [#allocation4], 1 }

</bundles_post_ra>
